<compile_context>
chip_gen: v6e
topology: v6e:2x2x1
jax: 0.10.0
libtpu: 0.0.40
codegen_flags: <defaults>
</compile_context>

<pallas_src>
import math

import jax
import jax.numpy as jnp
import numpy as np
from jax.experimental import pallas as pl
from jax.experimental.pallas import tpu as pltpu

_N_ACC_ROWS = 8  # accumulator rows per grid partition (padded to a full sublane tile)


# ---------------------------------------------------------------------------
# hardware-aware sizing
# ---------------------------------------------------------------------------
def _vmem_budget_and_limit():
    """Generation-aware VMEM sizing (v5e/v6e: 128 MiB physical, v7x: 64 MiB)."""
    cap = 64 * 1024 * 1024  # conservative fallback = v7x physical VMEM
    try:
        cap = int(getattr(pltpu.get_tpu_info(), "vmem_capacity_bytes", cap))
    except Exception:
        pass
    limit = max(32 * 1024 * 1024, cap - 16 * 1024 * 1024)      # kernel scoped-VMEM limit
    budget = max(16 * 1024 * 1024, limit - 16 * 1024 * 1024)   # double-buffered tile budget
    return budget, limit


def _eff_dtype(dt):
    dt = jnp.dtype(dt)
    if dt in (jnp.dtype(jnp.float32), jnp.dtype(jnp.bfloat16)):
        return dt
    return jnp.dtype(jnp.float32)


def _plan_tiles(batch, num_classes, dtypes, budget, tile_rows_cap=None):
    """Pick (b_pad, tile_rows, n_parts, steps_per_part).

    * tile rows are a multiple of the sublane packing (16 if any bf16, else 8),
    * tiles divide the padded batch exactly, so jnp.pad is a no-op whenever the
      batch is already sublane-aligned,
    * the largest tile whose double-buffered inputs fit `budget` wins, with a
      preference for an even tile count so the leading "parallel" grid axis can
      split the batch across both TensorCores on dual-core chips (v7x).
    """
    sub = 16 if any(jnp.dtype(d).itemsize == 2 for d in dtypes) else 8
    b_pad = -(-batch // sub) * sub
    bytes_per_row = sum(num_classes * jnp.dtype(d).itemsize for d in dtypes) + 4  # + int32 label
    tb_max = budget // (2 * bytes_per_row)            # 2x: double-buffered pipeline
    tb_max = max(sub, (tb_max // sub) * sub)
    tb_max = min(tb_max, b_pad)
    if tile_rows_cap is not None:
        tb_max = max(sub, min(tb_max, (int(tile_rows_cap) // sub) * sub))
    cands = [t for t in range(sub, tb_max + 1, sub) if b_pad % t == 0] or [sub]
    even = [t for t in cands if (b_pad // t) % 2 == 0]
    tb = max(even) if even else max(cands)
    n_tiles = b_pad // tb
    n_parts = 2 if n_tiles % 2 == 0 else 1
    return b_pad, tb, n_parts, n_tiles // n_parts


def _prep_inputs(logits_list, label, b_pad):
    """Sanitize dtypes (keep f32/bf16 as-is) and batch-pad only when needed."""
    arrays = []
    for x in logits_list:
        dt = _eff_dtype(x.dtype)
        if x.dtype != dt:
            x = x.astype(dt)
        if x.shape[0] != b_pad:
            x = jnp.pad(x, ((0, b_pad - x.shape[0]), (0, 0)))   # zero rows, masked via label==-1
        arrays.append(x)
    lab = label.reshape(-1).astype(jnp.int32)
    if lab.shape[0] != b_pad:
        lab = jnp.pad(lab, (0, b_pad - lab.shape[0]), constant_values=-1)
    return arrays, lab.reshape(b_pad, 1)


# ---------------------------------------------------------------------------
# in-kernel numerics helpers
# ---------------------------------------------------------------------------
def _lsm_and_softmax(x):
    """Single exp pass -> (log_softmax, softmax)."""
    m = jnp.max(x, axis=-1, keepdims=True)
    s = x - m
    e = jnp.exp(s)
    z = jnp.sum(e, axis=-1, keepdims=True)
    return s - jnp.log(z), e * (1.0 / z)


def _log_softmax(x):
    m = jnp.max(x, axis=-1, keepdims=True)
    s = x - m
    return s - jnp.log(jnp.sum(jnp.exp(s), axis=-1, keepdims=True))


def _softmax(x):
    m = jnp.max(x, axis=-1, keepdims=True)
    e = jnp.exp(x - m)
    return e * (1.0 / jnp.sum(e, axis=-1, keepdims=True))


# ---------------------------------------------------------------------------
# Pallas kernels
# ---------------------------------------------------------------------------
def _make_student_kernel(rampup):
    """Student branch. Accumulator rows (lane-wise, collapsed in the wrapper):
       0: sum(p_en * log p_en)           (KD teacher-entropy term, shared)
       1: sum(onehot * -log_softmax(pred_en))
       2..4: sum((onehot + r*p_en) * -log_softmax(pred_i))   (fused CE + KD)
       5..7: sum((softmax(pred_i) - peer_mean)^2)            (PM)
    """
    r = float(rampup)

    def kernel(label_ref, p1_ref, p2_ref, p3_ref, pen_ref,
               en_ref, m1_ref, m2_ref, m3_ref, out_ref):
        @pl.when(pl.program_id(1) == 0)
        def _init():
            out_ref[...] = jnp.zeros_like(out_ref)

        labels = label_ref[...]                                   # (tb, 1) int32
        tb, c = p1_ref.shape
        cls = jax.lax.broadcasted_iota(jnp.int32, (tb, c), 1)
        onehot = (cls == labels).astype(jnp.float32)              # padded rows -> all-zero
        valid = (labels >= 0).astype(jnp.float32)                 # (tb, 1) batch-pad row mask

        # ---- teacher-side terms: computed once, reused by all three branches ----
        lsm_en, sm_en = _lsm_and_softmax(en_ref[...].astype(jnp.float32))
        sm_en = sm_en * valid
        sm1 = _softmax(m1_ref[...].astype(jnp.float32))
        sm2 = _softmax(m2_ref[...].astype(jnp.float32))
        sm3 = _softmax(m3_ref[...].astype(jnp.float32))

        w = onehot + r * sm_en                                    # fused CE + KD weight

        out_ref[0:1, :] += jnp.sum(sm_en * lsm_en, axis=0, keepdims=True)
        out_ref[1:2, :] += jnp.sum(
            onehot * (-_log_softmax(pen_ref[...].astype(jnp.float32))),
            axis=0, keepdims=True)

        def branch(p_ref, peer_mean, k):
            lsm_p, sm_p = _lsm_and_softmax(p_ref[...].astype(jnp.float32))
            out_ref[2 + k:3 + k, :] += jnp.sum(w * (-lsm_p), axis=0, keepdims=True)
            d = (sm_p - peer_mean) * valid
            out_ref[5 + k:6 + k, :] += jnp.sum(d * d, axis=0, keepdims=True)

        branch(p1_ref, 0.5 * (sm2 + sm3), 0)
        branch(p2_ref, 0.5 * (sm1 + sm3), 1)
        branch(p3_ref, 0.5 * (sm1 + sm2), 2)

    return kernel


def _ema_kernel(label_ref, p1_ref, p2_ref, p3_ref, out_ref):
    """EMA branch: three plain cross-entropy sums (rows 0..2; rows 3..7 unused)."""
    @pl.when(pl.program_id(1) == 0)
    def _init():
        out_ref[...] = jnp.zeros_like(out_ref)

    labels = label_ref[...]
    tb, c = p1_ref.shape
    cls = jax.lax.broadcasted_iota(jnp.int32, (tb, c), 1)
    onehot = (cls == labels).astype(jnp.float32)

    for k, p_ref in enumerate((p1_ref, p2_ref, p3_ref)):
        out_ref[k:k + 1, :] += jnp.sum(
            onehot * (-_log_softmax(p_ref[...].astype(jnp.float32))),
            axis=0, keepdims=True)


# ---------------------------------------------------------------------------
# pallas_call wrapper
# ---------------------------------------------------------------------------
def _loss_call(kernel, labels2d, arrays, *, tb, n_parts, spp, vmem_limit):
    c = arrays[0].shape[1]
    bmap = lambda p, s: (p * spp + s, 0)          # batch block index for partition p, step s
    return pl.pallas_call(
        kernel,
        out_shape=jax.ShapeDtypeStruct((n_parts * _N_ACC_ROWS, c), jnp.float32),
        grid_spec=pltpu.PrefetchScalarGridSpec(
            num_scalar_prefetch=0,
            grid=(n_parts, spp),
            in_specs=[pl.BlockSpec((tb, 1), bmap)]
                     + [pl.BlockSpec((tb, c), bmap) for _ in arrays],
            # accumulator block: resident across the "arbitrary" step axis,
            # one private block per parallel partition (per TensorCore on v7x)
            out_specs=pl.BlockSpec((_N_ACC_ROWS, c), lambda p, s: (p, 0)),
        ),
        compiler_params=pltpu.CompilerParams(
            dimension_semantics=("parallel", "arbitrary"),
            vmem_limit_bytes=int(vmem_limit),
        ),
    )(labels2d, *arrays)


# ---------------------------------------------------------------------------
# Python wrapper mirroring LossWrapper.forward
# ---------------------------------------------------------------------------
class LossWrapper:
    def __init__(self, num_classes):
        self.num_classes = num_classes
        self.num_meter = 3

    @staticmethod
    def compute_rampup_weight(epoch, lambd=1.0, alpha=80):
        # kept verbatim from the PyTorch module (including the epoch/lambd term)
        if epoch > alpha:
            return lambd
        return lambd * math.exp(-5 * (1 - epoch / lambd) ** 2)

    def __call__(self, preds, targets, epoch, *, ema, _tile_rows=None):
        budget, vmem_limit = _vmem_budget_and_limit()
        if not ema:
            en_label, mean1, mean2, mean3, label = targets
            pred1, pred2, pred3, pred_en = preds
            b, c = pred1.shape
            rampup = self.compute_rampup_weight(epoch)   # host float -> folded constant
            logits = [pred1, pred2, pred3, pred_en, en_label, mean1, mean2, mean3]
            b_pad, tb, n_parts, spp = _plan_tiles(
                b, c, [_eff_dtype(x.dtype) for x in logits], budget, _tile_rows)
            arrays, lab2d = _prep_inputs(logits, label, b_pad)
            acc = _loss_call(_make_student_kernel(rampup), lab2d, arrays,
                             tb=tb, n_parts=n_parts, spp=spp, vmem_limit=vmem_limit)
            rows = acc.reshape(n_parts, _N_ACC_ROWS, c).sum(axis=(0, 2))   # (8,) totals
            inv_b = 1.0 / float(b)
            inv_bc = 1.0 / float(b * c)
            kd_common = rampup * rows[0] * inv_b
            loss_en = rows[1] * inv_b
            l1 = rows[2] * inv_b + kd_common + rampup * rows[5] * inv_bc
            l2 = rows[3] * inv_b + kd_common + rampup * rows[6] * inv_bc
            l3 = rows[4] * inv_b + kd_common + rampup * rows[7] * inv_bc
            loss = loss_en + l1 + l2 + l3
            return loss, (l1, l2, l3), (mean1, mean2, mean3)
        else:
            label = targets[0]
            pred1, pred2, pred3 = preds
            b, c = pred1.shape
            logits = [pred1, pred2, pred3]
            b_pad, tb, n_parts, spp = _plan_tiles(
                b, c, [_eff_dtype(x.dtype) for x in logits], budget, _tile_rows)
            arrays, lab2d = _prep_inputs(logits, label, b_pad)
            acc = _loss_call(_ema_kernel, lab2d, arrays,
                             tb=tb, n_parts=n_parts, spp=spp, vmem_limit=vmem_limit)
            rows = acc.reshape(n_parts, _N_ACC_ROWS, c).sum(axis=(0, 2))
            l1 = rows[0] / float(b)
            l2 = rows[1] / float(b)
            l3 = rows[2] / float(b)
            loss = l1 + l2 + l3
            return loss, (l1, l2, l3), (pred1, pred2, pred3)


# ---------------------------------------------------------------------------
# pure-JAX reference (correctness check)
# ---------------------------------------------------------------------------
def _ref_student(rampup, p1, p2, p3, pen, en, m1, m2, m3, label, num_classes):
    onehot = jax.nn.one_hot(label, num_classes, dtype=jnp.float32)

    def ce(lg):
        return -jnp.sum(onehot * jax.nn.log_softmax(lg, axis=-1)) / lg.shape[0]

    def kd(s, t):
        pt = jax.nn.softmax(t, axis=-1)
        return jnp.sum(pt * (jax.nn.log_softmax(t, -1) - jax.nn.log_softmax(s, -1))) / s.shape[0]

    def pm(s, a, b):
        d = jax.nn.softmax(s, -1) - 0.5 * (jax.nn.softmax(a, -1) + jax.nn.softmax(b, -1))
        return jnp.mean(d * d)

    l1 = ce(p1) + kd(p1, en) * rampup + pm(p1, m2, m3) * rampup
    l2 = ce(p2) + kd(p2, en) * rampup + pm(p2, m1, m3) * rampup
    l3 = ce(p3) + kd(p3, en) * rampup + pm(p3, m1, m2) * rampup
    return ce(pen) + l1 + l2 + l3, l1, l2, l3


def _ref_ema(p1, p2, p3, label, num_classes):
    onehot = jax.nn.one_hot(label, num_classes, dtype=jnp.float32)

    def ce(lg):
        return -jnp.sum(onehot * jax.nn.log_softmax(lg, axis=-1)) / lg.shape[0]

    l1, l2, l3 = ce(p1), ce(p2), ce(p3)
    return l1 + l2 + l3, l1, l2, l3


if __name__ == "__main__":
    C = 32
    wrapper = LossWrapper(num_classes=C)
    root = jax.random.PRNGKey(0)

    def make_inputs(B, tag):
        keys = jax.random.split(jax.random.fold_in(root, tag), 9)
        arrs = [jax.random.normal(k, (B, C), jnp.float32) for k in keys[:8]]
        label = jax.random.randint(keys[8], (B,), 0, C)
        return arrs, label

    def check(got, want, tol=1e-3):
        np.testing.assert_allclose(np.array(got), np.array(want), rtol=tol, atol=tol)

    epoch = 100
    ru = wrapper.compute_rampup_weight(epoch)

    # ---- student branch, B=8 (single tile, single partition) ----
    (p1, p2, p3, pen, en, m1, m2, m3), label = make_inputs(8, 0)
    loss, (l1, l2, l3), _ = wrapper([p1, p2, p3, pen], [en, m1, m2, m3, label], epoch, ema=False)
    jax.block_until_ready(loss)
    r_loss, r1, r2, r3 = _ref_student(ru, p1, p2, p3, pen, en, m1, m2, m3, label, C)
    check(loss, r_loss); check(l1, r1); check(l2, r2); check(l3, r3)

    # ---- student branch, B=5 (exercises batch padding + row masking) ----
    (q1, q2, q3, qen, qe, n1, n2, n3), lab5 = make_inputs(5, 1)
    loss5, (a1, a2, a3), _ = wrapper([q1, q2, q3, qen], [qe, n1, n2, n3, lab5], epoch, ema=False)
    jax.block_until_ready(loss5)
    s_loss, s1, s2, s3 = _ref_student(ru, q1, q2, q3, qen, qe, n1, n2, n3, lab5, C)
    check(loss5, s_loss); check(a1, s1); check(a2, s2); check(a3, s3)

    # ---- student branch, B=64, forced 16-row tiles -> grid (2 parts, 2 steps) ----
    (u1, u2, u3, uen, ue, v1, v2, v3), lab64 = make_inputs(64, 2)
    loss64, (b1, b2, b3), _ = wrapper([u1, u2, u3, uen], [ue, v1, v2, v3, lab64],
                                      epoch, ema=False, _tile_rows=16)
    jax.block_until_ready(loss64)
    g_loss, g1, g2, g3 = _ref_student(ru, u1, u2, u3, uen, ue, v1, v2, v3, lab64, C)
    check(loss64, g_loss); check(b1, g1); check(b2, g2); check(b3, g3)

    # ---- student branch, bf16 inputs (DMA'd as bf16, upcast in-kernel) ----
    bf = [x.astype(jnp.bfloat16) for x in (p1, p2, p3, pen, en, m1, m2, m3)]
    loss_bf, (c1, c2, c3), _ = wrapper(bf[:4], bf[4:] + [label], epoch, ema=False)
    jax.block_until_ready(loss_bf)
    f32 = [x.astype(jnp.float32) for x in bf]
    h_loss, h1, h2, h3 = _ref_student(ru, *f32, label, C)
    check(loss_bf, h_loss); check(c1, h1); check(c2, h2); check(c3, h3)

    # ---- EMA (teacher) branch, B=8 ----
    loss_e, (e1, e2, e3), _ = wrapper([p1, p2, p3], [label], epoch, ema=True)
    jax.block_until_ready(loss_e)
    t_loss, t1, t2, t3 = _ref_ema(p1, p2, p3, label, C)
    check(loss_e, t_loss); check(e1, t1); check(e2, t2); check(e3, t3)

    print("KERNEL_OK")
</pallas_src>

<mosaic_0001>
module attributes {stable_mosaic.version = 11 : i64} {
  func.func @kernel(%arg0: i32, %arg1: i32, %arg2: memref<8x1xi32, #tpu.memory_space<vmem>>, %arg3: memref<8x32xf32, #tpu.memory_space<vmem>>, %arg4: memref<8x32xf32, #tpu.memory_space<vmem>>, %arg5: memref<8x32xf32, #tpu.memory_space<vmem>>, %arg6: memref<8x32xf32, #tpu.memory_space<vmem>>, %arg7: memref<8x32xf32, #tpu.memory_space<vmem>>, %arg8: memref<8x32xf32, #tpu.memory_space<vmem>>, %arg9: memref<8x32xf32, #tpu.memory_space<vmem>>, %arg10: memref<8x32xf32, #tpu.memory_space<vmem>>, %arg11: memref<8x32xf32, #tpu.memory_space<vmem>>) attributes {dimension_semantics = [#tpu.dimension_semantics<parallel>, #tpu.dimension_semantics<arbitrary>], iteration_bounds = array<i64: 1, 1>, scalar_prefetch = 0 : i64, scratch_operands = 0 : i64, tpu.core_type = #tpu.core_type<tc>, window_params = [{transform_indices = @transform_0, window_bounds = array<i64: 8, 1>}, {transform_indices = @transform_1, window_bounds = array<i64: 8, 32>}, {transform_indices = @transform_2, window_bounds = array<i64: 8, 32>}, {transform_indices = @transform_3, window_bounds = array<i64: 8, 32>}, {transform_indices = @transform_4, window_bounds = array<i64: 8, 32>}, {transform_indices = @transform_5, window_bounds = array<i64: 8, 32>}, {transform_indices = @transform_6, window_bounds = array<i64: 8, 32>}, {transform_indices = @transform_7, window_bounds = array<i64: 8, 32>}, {transform_indices = @transform_8, window_bounds = array<i64: 8, 32>}, {transform_indices = @transform_9, window_bounds = array<i64: 8, 32>}]} {
    %c0_i32 = arith.constant 0 : i32
    %0 = arith.cmpi eq, %arg1, %c0_i32 : i32
    %1 = arith.extui %0 : i1 to i32
    %c0_i32_0 = arith.constant 0 : i32
    %2 = arith.cmpi ne, %1, %c0_i32_0 : i32
    scf.if %2 {
      %cst_82 = arith.constant 0.000000e+00 : f32
      %199 = vector.broadcast %cst_82 : f32 to vector<8x32xf32>
      %c0_83 = arith.constant 0 : index
      %c0_84 = arith.constant 0 : index
      %200 = vector.load %arg11[%c0_83, %c0_84] : memref<8x32xf32, #tpu.memory_space<vmem>>, vector<8x32xf32>
      tpu.vector_store %arg11[%c0_83, %c0_84], %199 {strides = array<i32>} : memref<8x32xf32, #tpu.memory_space<vmem>>, vector<8x32xf32>,
    } else {
    }
    %c0 = arith.constant 0 : index
    %c0_1 = arith.constant 0 : index
    %3 = vector.load %arg2[%c0, %c0_1] : memref<8x1xi32, #tpu.memory_space<vmem>>, vector<8x1xi32>
    %4 = tpu.iota {dimensions = array<i32: 1>} : vector<8x32xi32>
    %5 = vector.broadcast %3 : vector<8x1xi32> to vector<8x32xi32>
    %6 = arith.cmpi eq, %4, %5 : vector<8x32xi32>
    %7 = arith.extui %6 : vector<8x32xi1> to vector<8x32xi32>
    %8 = arith.sitofp %7 : vector<8x32xi32> to vector<8x32xf32>
    %c0_i32_2 = arith.constant 0 : i32
    %9 = vector.broadcast %c0_i32_2 : i32 to vector<8x1xi32>
    %10 = arith.cmpi sge, %3, %9 : vector<8x1xi32>
    %11 = arith.extui %10 : vector<8x1xi1> to vector<8x1xi32>
    %12 = arith.sitofp %11 : vector<8x1xi32> to vector<8x1xf32>
    %c0_3 = arith.constant 0 : index
    %c0_4 = arith.constant 0 : index
    %13 = vector.load %arg7[%c0_3, %c0_4] : memref<8x32xf32, #tpu.memory_space<vmem>>, vector<8x32xf32>
    %cst = arith.constant dense<0xFF800000> : vector<8xf32>
    %14 = vector.multi_reduction <maximumf>, %13, %cst [1] : vector<8x32xf32> to vector<8xf32>
    %15 = vector.shape_cast %14 : vector<8xf32> to vector<8x1xf32>
    %16 = vector.broadcast %15 : vector<8x1xf32> to vector<8x32xf32>
    %17 = arith.subf %13, %16 : vector<8x32xf32>
    %18 = math.exp %17 : vector<8x32xf32>
    %cst_5 = arith.constant dense<0.000000e+00> : vector<8xf32>
    %19 = vector.multi_reduction <add>, %18, %cst_5 [1] : vector<8x32xf32> to vector<8xf32>
    %20 = vector.shape_cast %19 : vector<8xf32> to vector<8x1xf32>
    %21 = math.log %20 : vector<8x1xf32>
    %22 = vector.broadcast %21 : vector<8x1xf32> to vector<8x32xf32>
    %23 = arith.subf %17, %22 : vector<8x32xf32>
    %cst_6 = arith.constant 1.000000e+00 : f32
    %24 = vector.broadcast %cst_6 : f32 to vector<8x1xf32>
    %25 = arith.divf %24, %20 : vector<8x1xf32>
    %26 = vector.broadcast %25 : vector<8x1xf32> to vector<8x32xf32>
    %27 = arith.mulf %18, %26 : vector<8x32xf32>
    %28 = vector.broadcast %12 : vector<8x1xf32> to vector<8x32xf32>
    %29 = arith.mulf %27, %28 : vector<8x32xf32>
    %c0_7 = arith.constant 0 : index
    %c0_8 = arith.constant 0 : index
    %30 = vector.load %arg8[%c0_7, %c0_8] : memref<8x32xf32, #tpu.memory_space<vmem>>, vector<8x32xf32>
    %cst_9 = arith.constant dense<0xFF800000> : vector<8xf32>
    %31 = vector.multi_reduction <maximumf>, %30, %cst_9 [1] : vector<8x32xf32> to vector<8xf32>
    %32 = vector.shape_cast %31 : vector<8xf32> to vector<8x1xf32>
    %33 = vector.broadcast %32 : vector<8x1xf32> to vector<8x32xf32>
    %34 = arith.subf %30, %33 : vector<8x32xf32>
    %35 = math.exp %34 : vector<8x32xf32>
    %cst_10 = arith.constant dense<0.000000e+00> : vector<8xf32>
    %36 = vector.multi_reduction <add>, %35, %cst_10 [1] : vector<8x32xf32> to vector<8xf32>
    %37 = vector.shape_cast %36 : vector<8xf32> to vector<8x1xf32>
    %cst_11 = arith.constant 1.000000e+00 : f32
    %38 = vector.broadcast %cst_11 : f32 to vector<8x1xf32>
    %39 = arith.divf %38, %37 : vector<8x1xf32>
    %40 = vector.broadcast %39 : vector<8x1xf32> to vector<8x32xf32>
    %41 = arith.mulf %35, %40 : vector<8x32xf32>
    %c0_12 = arith.constant 0 : index
    %c0_13 = arith.constant 0 : index
    %42 = vector.load %arg9[%c0_12, %c0_13] : memref<8x32xf32, #tpu.memory_space<vmem>>, vector<8x32xf32>
    %cst_14 = arith.constant dense<0xFF800000> : vector<8xf32>
    %43 = vector.multi_reduction <maximumf>, %42, %cst_14 [1] : vector<8x32xf32> to vector<8xf32>
    %44 = vector.shape_cast %43 : vector<8xf32> to vector<8x1xf32>
    %45 = vector.broadcast %44 : vector<8x1xf32> to vector<8x32xf32>
    %46 = arith.subf %42, %45 : vector<8x32xf32>
    %47 = math.exp %46 : vector<8x32xf32>
    %cst_15 = arith.constant dense<0.000000e+00> : vector<8xf32>
    %48 = vector.multi_reduction <add>, %47, %cst_15 [1] : vector<8x32xf32> to vector<8xf32>
    %49 = vector.shape_cast %48 : vector<8xf32> to vector<8x1xf32>
    %cst_16 = arith.constant 1.000000e+00 : f32
    %50 = vector.broadcast %cst_16 : f32 to vector<8x1xf32>
    %51 = arith.divf %50, %49 : vector<8x1xf32>
    %52 = vector.broadcast %51 : vector<8x1xf32> to vector<8x32xf32>
    %53 = arith.mulf %47, %52 : vector<8x32xf32>
    %c0_17 = arith.constant 0 : index
    %c0_18 = arith.constant 0 : index
    %54 = vector.load %arg10[%c0_17, %c0_18] : memref<8x32xf32, #tpu.memory_space<vmem>>, vector<8x32xf32>
    %cst_19 = arith.constant dense<0xFF800000> : vector<8xf32>
    %55 = vector.multi_reduction <maximumf>, %54, %cst_19 [1] : vector<8x32xf32> to vector<8xf32>
    %56 = vector.shape_cast %55 : vector<8xf32> to vector<8x1xf32>
    %57 = vector.broadcast %56 : vector<8x1xf32> to vector<8x32xf32>
    %58 = arith.subf %54, %57 : vector<8x32xf32>
    %59 = math.exp %58 : vector<8x32xf32>
    %cst_20 = arith.constant dense<0.000000e+00> : vector<8xf32>
    %60 = vector.multi_reduction <add>, %59, %cst_20 [1] : vector<8x32xf32> to vector<8xf32>
    %61 = vector.shape_cast %60 : vector<8xf32> to vector<8x1xf32>
    %cst_21 = arith.constant 1.000000e+00 : f32
    %62 = vector.broadcast %cst_21 : f32 to vector<8x1xf32>
    %63 = arith.divf %62, %61 : vector<8x1xf32>
    %64 = vector.broadcast %63 : vector<8x1xf32> to vector<8x32xf32>
    %65 = arith.mulf %59, %64 : vector<8x32xf32>
    %cst_22 = arith.constant 1.000000e+00 : f32
    %66 = vector.broadcast %cst_22 : f32 to vector<8x32xf32>
    %67 = arith.mulf %66, %29 : vector<8x32xf32>
    %68 = arith.addf %8, %67 : vector<8x32xf32>
    %c0_23 = arith.constant 0 : index
    %c0_24 = arith.constant 0 : index
    %69 = vector.load %arg11[%c0_23, %c0_24] : memref<8x32xf32, #tpu.memory_space<vmem>>, vector<1x32xf32>
    %70 = arith.mulf %29, %23 : vector<8x32xf32>
    %cst_25 = arith.constant dense<0.000000e+00> : vector<32xf32>
    %71 = vector.multi_reduction <add>, %70, %cst_25 [0] : vector<8x32xf32> to vector<32xf32>
    %72 = vector.shape_cast %71 : vector<32xf32> to vector<1x32xf32>
    %73 = arith.addf %69, %72 : vector<1x32xf32>
    %c0_26 = arith.constant 0 : index
    %c0_27 = arith.constant 0 : index
    %74 = vector.load %arg11[%c0_26, %c0_27] : memref<8x32xf32, #tpu.memory_space<vmem>>, vector<1x32xf32>
    tpu.vector_store %arg11[%c0_26, %c0_27], %73 {strides = array<i32>} : memref<8x32xf32, #tpu.memory_space<vmem>>, vector<1x32xf32>,
    %c1 = arith.constant 1 : index
    %c0_28 = arith.constant 0 : index
    %75 = vector.load %arg11[%c1, %c0_28] : memref<8x32xf32, #tpu.memory_space<vmem>>, vector<1x32xf32>
    %c0_29 = arith.constant 0 : index
    %c0_30 = arith.constant 0 : index
    %76 = vector.load %arg6[%c0_29, %c0_30] : memref<8x32xf32, #tpu.memory_space<vmem>>, vector<8x32xf32>
    %cst_31 = arith.constant dense<0xFF800000> : vector<8xf32>
    %77 = vector.multi_reduction <maximumf>, %76, %cst_31 [1] : vector<8x32xf32> to vector<8xf32>
    %78 = vector.shape_cast %77 : vector<8xf32> to vector<8x1xf32>
    %79 = vector.broadcast %78 : vector<8x1xf32> to vector<8x32xf32>
    %80 = arith.subf %76, %79 : vector<8x32xf32>
    %81 = math.exp %80 : vector<8x32xf32>
    %cst_32 = arith.constant dense<0.000000e+00> : vector<8xf32>
    %82 = vector.multi_reduction <add>, %81, %cst_32 [1] : vector<8x32xf32> to vector<8xf32>
    %83 = vector.shape_cast %82 : vector<8xf32> to vector<8x1xf32>
    %84 = math.log %83 : vector<8x1xf32>
    %85 = vector.broadcast %84 : vector<8x1xf32> to vector<8x32xf32>
    %86 = arith.subf %80, %85 : vector<8x32xf32>
    %cst_33 = arith.constant 0.000000e+00 : f32
    %87 = vector.broadcast %cst_33 : f32 to vector<8x32xf32>
    %88 = arith.subf %87, %86 : vector<8x32xf32>
    %89 = arith.mulf %8, %88 : vector<8x32xf32>
    %cst_34 = arith.constant dense<0.000000e+00> : vector<32xf32>
    %90 = vector.multi_reduction <add>, %89, %cst_34 [0] : vector<8x32xf32> to vector<32xf32>
    %91 = vector.shape_cast %90 : vector<32xf32> to vector<1x32xf32>
    %92 = arith.addf %75, %91 : vector<1x32xf32>
    %c1_35 = arith.constant 1 : index
    %c0_36 = arith.constant 0 : index
    %93 = vector.load %arg11[%c1_35, %c0_36] : memref<8x32xf32, #tpu.memory_space<vmem>>, vector<1x32xf32>
    tpu.vector_store %arg11[%c1_35, %c0_36], %92 {strides = array<i32>} : memref<8x32xf32, #tpu.memory_space<vmem>>, vector<1x32xf32>,
    %94 = arith.addf %53, %65 : vector<8x32xf32>
    %cst_37 = arith.constant 5.000000e-01 : f32
    %95 = vector.broadcast %cst_37 : f32 to vector<8x32xf32>
    %96 = arith.mulf %95, %94 : vector<8x32xf32>
    %c0_38 = arith.constant 0 : index
    %c0_39 = arith.constant 0 : index
    %97 = vector.load %arg3[%c0_38, %c0_39] : memref<8x32xf32, #tpu.memory_space<vmem>>, vector<8x32xf32>
    %cst_40 = arith.constant dense<0xFF800000> : vector<8xf32>
    %98 = vector.multi_reduction <maximumf>, %97, %cst_40 [1] : vector<8x32xf32> to vector<8xf32>
    %99 = vector.shape_cast %98 : vector<8xf32> to vector<8x1xf32>
    %100 = vector.broadcast %99 : vector<8x1xf32> to vector<8x32xf32>
    %101 = arith.subf %97, %100 : vector<8x32xf32>
    %102 = math.exp %101 : vector<8x32xf32>
    %cst_41 = arith.constant dense<0.000000e+00> : vector<8xf32>
    %103 = vector.multi_reduction <add>, %102, %cst_41 [1] : vector<8x32xf32> to vector<8xf32>
    %104 = vector.shape_cast %103 : vector<8xf32> to vector<8x1xf32>
    %105 = math.log %104 : vector<8x1xf32>
    %106 = vector.broadcast %105 : vector<8x1xf32> to vector<8x32xf32>
    %107 = arith.subf %101, %106 : vector<8x32xf32>
    %cst_42 = arith.constant 1.000000e+00 : f32
    %108 = vector.broadcast %cst_42 : f32 to vector<8x1xf32>
    %109 = arith.divf %108, %104 : vector<8x1xf32>
    %110 = vector.broadcast %109 : vector<8x1xf32> to vector<8x32xf32>
    %111 = arith.mulf %102, %110 : vector<8x32xf32>
    %c2 = arith.constant 2 : index
    %c0_43 = arith.constant 0 : index
    %112 = vector.load %arg11[%c2, %c0_43] : memref<8x32xf32, #tpu.memory_space<vmem>>, vector<1x32xf32>
    %cst_44 = arith.constant 0.000000e+00 : f32
    %113 = vector.broadcast %cst_44 : f32 to vector<8x32xf32>
    %114 = arith.subf %113, %107 : vector<8x32xf32>
    %115 = arith.mulf %68, %114 : vector<8x32xf32>
    %cst_45 = arith.constant dense<0.000000e+00> : vector<32xf32>
    %116 = vector.multi_reduction <add>, %115, %cst_45 [0] : vector<8x32xf32> to vector<32xf32>
    %117 = vector.shape_cast %116 : vector<32xf32> to vector<1x32xf32>
    %118 = arith.addf %112, %117 : vector<1x32xf32>
    %c2_46 = arith.constant 2 : index
    %c0_47 = arith.constant 0 : index
    %119 = vector.load %arg11[%c2_46, %c0_47] : memref<8x32xf32, #tpu.memory_space<vmem>>, vector<1x32xf32>
    tpu.vector_store %arg11[%c2_46, %c0_47], %118 {strides = array<i32>} : memref<8x32xf32, #tpu.memory_space<vmem>>, vector<1x32xf32>,
    %120 = arith.subf %111, %96 : vector<8x32xf32>
    %121 = vector.broadcast %12 : vector<8x1xf32> to vector<8x32xf32>
    %122 = arith.mulf %120, %121 : vector<8x32xf32>
    %c5 = arith.constant 5 : index
    %c0_48 = arith.constant 0 : index
    %123 = vector.load %arg11[%c5, %c0_48] : memref<8x32xf32, #tpu.memory_space<vmem>>, vector<1x32xf32>
    %124 = arith.mulf %122, %122 : vector<8x32xf32>
    %cst_49 = arith.constant dense<0.000000e+00> : vector<32xf32>
    %125 = vector.multi_reduction <add>, %124, %cst_49 [0] : vector<8x32xf32> to vector<32xf32>
    %126 = vector.shape_cast %125 : vector<32xf32> to vector<1x32xf32>
    %127 = arith.addf %123, %126 : vector<1x32xf32>
    %c5_50 = arith.constant 5 : index
    %c0_51 = arith.constant 0 : index
    %128 = vector.load %arg11[%c5_50, %c0_51] : memref<8x32xf32, #tpu.memory_space<vmem>>, vector<1x32xf32>
    tpu.vector_store %arg11[%c5_50, %c0_51], %127 {strides = array<i32>} : memref<8x32xf32, #tpu.memory_space<vmem>>, vector<1x32xf32>,
    %129 = arith.addf %41, %65 : vector<8x32xf32>
    %cst_52 = arith.constant 5.000000e-01 : f32
    %130 = vector.broadcast %cst_52 : f32 to vector<8x32xf32>
    %131 = arith.mulf %130, %129 : vector<8x32xf32>
    %c0_53 = arith.constant 0 : index
    %c0_54 = arith.constant 0 : index
    %132 = vector.load %arg4[%c0_53, %c0_54] : memref<8x32xf32, #tpu.memory_space<vmem>>, vector<8x32xf32>
    %cst_55 = arith.constant dense<0xFF800000> : vector<8xf32>
    %133 = vector.multi_reduction <maximumf>, %132, %cst_55 [1] : vector<8x32xf32> to vector<8xf32>
    %134 = vector.shape_cast %133 : vector<8xf32> to vector<8x1xf32>
    %135 = vector.broadcast %134 : vector<8x1xf32> to vector<8x32xf32>
    %136 = arith.subf %132, %135 : vector<8x32xf32>
    %137 = math.exp %136 : vector<8x32xf32>
    %cst_56 = arith.constant dense<0.000000e+00> : vector<8xf32>
    %138 = vector.multi_reduction <add>, %137, %cst_56 [1] : vector<8x32xf32> to vector<8xf32>
    %139 = vector.shape_cast %138 : vector<8xf32> to vector<8x1xf32>
    %140 = math.log %139 : vector<8x1xf32>
    %141 = vector.broadcast %140 : vector<8x1xf32> to vector<8x32xf32>
    %142 = arith.subf %136, %141 : vector<8x32xf32>
    %cst_57 = arith.constant 1.000000e+00 : f32
    %143 = vector.broadcast %cst_57 : f32 to vector<8x1xf32>
    %144 = arith.divf %143, %139 : vector<8x1xf32>
    %145 = vector.broadcast %144 : vector<8x1xf32> to vector<8x32xf32>
    %146 = arith.mulf %137, %145 : vector<8x32xf32>
    %c3 = arith.constant 3 : index
    %c0_58 = arith.constant 0 : index
    %147 = vector.load %arg11[%c3, %c0_58] : memref<8x32xf32, #tpu.memory_space<vmem>>, vector<1x32xf32>
    %cst_59 = arith.constant 0.000000e+00 : f32
    %148 = vector.broadcast %cst_59 : f32 to vector<8x32xf32>
    %149 = arith.subf %148, %142 : vector<8x32xf32>
    %150 = arith.mulf %68, %149 : vector<8x32xf32>
    %cst_60 = arith.constant dense<0.000000e+00> : vector<32xf32>
    %151 = vector.multi_reduction <add>, %150, %cst_60 [0] : vector<8x32xf32> to vector<32xf32>
    %152 = vector.shape_cast %151 : vector<32xf32> to vector<1x32xf32>
    %153 = arith.addf %147, %152 : vector<1x32xf32>
    %c3_61 = arith.constant 3 : index
    %c0_62 = arith.constant 0 : index
    %154 = vector.load %arg11[%c3_61, %c0_62] : memref<8x32xf32, #tpu.memory_space<vmem>>, vector<1x32xf32>
    tpu.vector_store %arg11[%c3_61, %c0_62], %153 {strides = array<i32>} : memref<8x32xf32, #tpu.memory_space<vmem>>, vector<1x32xf32>,
    %155 = arith.subf %146, %131 : vector<8x32xf32>
    %156 = vector.broadcast %12 : vector<8x1xf32> to vector<8x32xf32>
    %157 = arith.mulf %155, %156 : vector<8x32xf32>
    %c6 = arith.constant 6 : index
    %c0_63 = arith.constant 0 : index
    %158 = vector.load %arg11[%c6, %c0_63] : memref<8x32xf32, #tpu.memory_space<vmem>>, vector<1x32xf32>
    %159 = arith.mulf %157, %157 : vector<8x32xf32>
    %cst_64 = arith.constant dense<0.000000e+00> : vector<32xf32>
    %160 = vector.multi_reduction <add>, %159, %cst_64 [0] : vector<8x32xf32> to vector<32xf32>
    %161 = vector.shape_cast %160 : vector<32xf32> to vector<1x32xf32>
    %162 = arith.addf %158, %161 : vector<1x32xf32>
    %c6_65 = arith.constant 6 : index
    %c0_66 = arith.constant 0 : index
    %163 = vector.load %arg11[%c6_65, %c0_66] : memref<8x32xf32, #tpu.memory_space<vmem>>, vector<1x32xf32>
    tpu.vector_store %arg11[%c6_65, %c0_66], %162 {strides = array<i32>} : memref<8x32xf32, #tpu.memory_space<vmem>>, vector<1x32xf32>,
    %164 = arith.addf %41, %53 : vector<8x32xf32>
    %cst_67 = arith.constant 5.000000e-01 : f32
    %165 = vector.broadcast %cst_67 : f32 to vector<8x32xf32>
    %166 = arith.mulf %165, %164 : vector<8x32xf32>
    %c0_68 = arith.constant 0 : index
    %c0_69 = arith.constant 0 : index
    %167 = vector.load %arg5[%c0_68, %c0_69] : memref<8x32xf32, #tpu.memory_space<vmem>>, vector<8x32xf32>
    %cst_70 = arith.constant dense<0xFF800000> : vector<8xf32>
    %168 = vector.multi_reduction <maximumf>, %167, %cst_70 [1] : vector<8x32xf32> to vector<8xf32>
    %169 = vector.shape_cast %168 : vector<8xf32> to vector<8x1xf32>
    %170 = vector.broadcast %169 : vector<8x1xf32> to vector<8x32xf32>
    %171 = arith.subf %167, %170 : vector<8x32xf32>
    %172 = math.exp %171 : vector<8x32xf32>
    %cst_71 = arith.constant dense<0.000000e+00> : vector<8xf32>
    %173 = vector.multi_reduction <add>, %172, %cst_71 [1] : vector<8x32xf32> to vector<8xf32>
    %174 = vector.shape_cast %173 : vector<8xf32> to vector<8x1xf32>
    %175 = math.log %174 : vector<8x1xf32>
    %176 = vector.broadcast %175 : vector<8x1xf32> to vector<8x32xf32>
    %177 = arith.subf %171, %176 : vector<8x32xf32>
    %cst_72 = arith.constant 1.000000e+00 : f32
    %178 = vector.broadcast %cst_72 : f32 to vector<8x1xf32>
    %179 = arith.divf %178, %174 : vector<8x1xf32>
    %180 = vector.broadcast %179 : vector<8x1xf32> to vector<8x32xf32>
    %181 = arith.mulf %172, %180 : vector<8x32xf32>
    %c4 = arith.constant 4 : index
    %c0_73 = arith.constant 0 : index
    %182 = vector.load %arg11[%c4, %c0_73] : memref<8x32xf32, #tpu.memory_space<vmem>>, vector<1x32xf32>
    %cst_74 = arith.constant 0.000000e+00 : f32
    %183 = vector.broadcast %cst_74 : f32 to vector<8x32xf32>
    %184 = arith.subf %183, %177 : vector<8x32xf32>
    %185 = arith.mulf %68, %184 : vector<8x32xf32>
    %cst_75 = arith.constant dense<0.000000e+00> : vector<32xf32>
    %186 = vector.multi_reduction <add>, %185, %cst_75 [0] : vector<8x32xf32> to vector<32xf32>
    %187 = vector.shape_cast %186 : vector<32xf32> to vector<1x32xf32>
    %188 = arith.addf %182, %187 : vector<1x32xf32>
    %c4_76 = arith.constant 4 : index
    %c0_77 = arith.constant 0 : index
    %189 = vector.load %arg11[%c4_76, %c0_77] : memref<8x32xf32, #tpu.memory_space<vmem>>, vector<1x32xf32>
    tpu.vector_store %arg11[%c4_76, %c0_77], %188 {strides = array<i32>} : memref<8x32xf32, #tpu.memory_space<vmem>>, vector<1x32xf32>,
    %190 = arith.subf %181, %166 : vector<8x32xf32>
    %191 = vector.broadcast %12 : vector<8x1xf32> to vector<8x32xf32>
    %192 = arith.mulf %190, %191 : vector<8x32xf32>
    %c7 = arith.constant 7 : index
    %c0_78 = arith.constant 0 : index
    %193 = vector.load %arg11[%c7, %c0_78] : memref<8x32xf32, #tpu.memory_space<vmem>>, vector<1x32xf32>
    %194 = arith.mulf %192, %192 : vector<8x32xf32>
    %cst_79 = arith.constant dense<0.000000e+00> : vector<32xf32>
    %195 = vector.multi_reduction <add>, %194, %cst_79 [0] : vector<8x32xf32> to vector<32xf32>
    %196 = vector.shape_cast %195 : vector<32xf32> to vector<1x32xf32>
    %197 = arith.addf %193, %196 : vector<1x32xf32>
    %c7_80 = arith.constant 7 : index
    %c0_81 = arith.constant 0 : index
    %198 = vector.load %arg11[%c7_80, %c0_81] : memref<8x32xf32, #tpu.memory_space<vmem>>, vector<1x32xf32>
    tpu.vector_store %arg11[%c7_80, %c0_81], %197 {strides = array<i32>} : memref<8x32xf32, #tpu.memory_space<vmem>>, vector<1x32xf32>,
    return
  }
  func.func @transform_0(%arg0: i32, %arg1: i32) -> (i32, i32) {
    %c1_i32 = arith.constant 1 : i32
    %0 = arith.muli %arg0, %c1_i32 : i32
    %1 = arith.addi %0, %arg1 : i32
    %c0_i32 = arith.constant 0 : i32
    %c0_i32_0 = arith.constant 0 : i32
    return %1, %c0_i32 : i32, i32
  }
  func.func @transform_1(%arg0: i32, %arg1: i32) -> (i32, i32) {
    %c1_i32 = arith.constant 1 : i32
    %0 = arith.muli %arg0, %c1_i32 : i32
    %1 = arith.addi %0, %arg1 : i32
    %c0_i32 = arith.constant 0 : i32
    %c0_i32_0 = arith.constant 0 : i32
    return %1, %c0_i32 : i32, i32
  }
  func.func @transform_2(%arg0: i32, %arg1: i32) -> (i32, i32) {
    %c1_i32 = arith.constant 1 : i32
    %0 = arith.muli %arg0, %c1_i32 : i32
    %1 = arith.addi %0, %arg1 : i32
    %c0_i32 = arith.constant 0 : i32
    %c0_i32_0 = arith.constant 0 : i32
    return %1, %c0_i32 : i32, i32
  }
  func.func @transform_3(%arg0: i32, %arg1: i32) -> (i32, i32) {
    %c1_i32 = arith.constant 1 : i32
    %0 = arith.muli %arg0, %c1_i32 : i32
    %1 = arith.addi %0, %arg1 : i32
    %c0_i32 = arith.constant 0 : i32
    %c0_i32_0 = arith.constant 0 : i32
    return %1, %c0_i32 : i32, i32
  }
  func.func @transform_4(%arg0: i32, %arg1: i32) -> (i32, i32) {
    %c1_i32 = arith.constant 1 : i32
    %0 = arith.muli %arg0, %c1_i32 : i32
    %1 = arith.addi %0, %arg1 : i32
    %c0_i32 = arith.constant 0 : i32
    %c0_i32_0 = arith.constant 0 : i32
    return %1, %c0_i32 : i32, i32
  }
  func.func @transform_5(%arg0: i32, %arg1: i32) -> (i32, i32) {
    %c1_i32 = arith.constant 1 : i32
    %0 = arith.muli %arg0, %c1_i32 : i32
    %1 = arith.addi %0, %arg1 : i32
    %c0_i32 = arith.constant 0 : i32
    %c0_i32_0 = arith.constant 0 : i32
    return %1, %c0_i32 : i32, i32
  }
  func.func @transform_6(%arg0: i32, %arg1: i32) -> (i32, i32) {
    %c1_i32 = arith.constant 1 : i32
    %0 = arith.muli %arg0, %c1_i32 : i32
    %1 = arith.addi %0, %arg1 : i32
    %c0_i32 = arith.constant 0 : i32
    %c0_i32_0 = arith.constant 0 : i32
    return %1, %c0_i32 : i32, i32
  }
  func.func @transform_7(%arg0: i32, %arg1: i32) -> (i32, i32) {
    %c1_i32 = arith.constant 1 : i32
    %0 = arith.muli %arg0, %c1_i32 : i32
    %1 = arith.addi %0, %arg1 : i32
    %c0_i32 = arith.constant 0 : i32
    %c0_i32_0 = arith.constant 0 : i32
    return %1, %c0_i32 : i32, i32
  }
  func.func @transform_8(%arg0: i32, %arg1: i32) -> (i32, i32) {
    %c1_i32 = arith.constant 1 : i32
    %0 = arith.muli %arg0, %c1_i32 : i32
    %1 = arith.addi %0, %arg1 : i32
    %c0_i32 = arith.constant 0 : i32
    %c0_i32_0 = arith.constant 0 : i32
    return %1, %c0_i32 : i32, i32
  }
  func.func @transform_9(%arg0: i32, %arg1: i32) -> (i32, i32) {
    %c0_i32 = arith.constant 0 : i32
    %c0_i32_0 = arith.constant 0 : i32
    return %arg0, %c0_i32 : i32, i32
  }
}

</mosaic_0001>

<bundles_post_ra>
// kernel: tpu_custom_call.1
= control target key start
LH: loop header
LB: loop body
LE: loop exit
PB: predicated region body
PF: predicated region fallthrough
CT: control target
= control target key end

     0   :  { %14 = vsyncpa [#allocation3], 0  ;;  %s821_s0 = inlined_call_operand.vmem [shape: s32[8,1], index: 0, kind: input, shape index: {}]   ;;  %s822_s1 = inlined_call_operand.vmem [shape: f32[8,32], index: 1, kind: input, shape index: {}]   ;;  %s823_s2 = inlined_call_operand.hbm [shape: f32[8,32], index: 2, kind: input, shape index: {}]   ;;  %s824_s3 = inlined_call_operand.hbm [shape: f32[8,32], index: 3, kind: input, shape index: {}]   ;;  %s825_s4 = inlined_call_operand.vmem [shape: f32[8,32], index: 4, kind: input, shape index: {}]   ;;  %s826_s5 = inlined_call_operand.hbm [shape: f32[8,32], index: 5, kind: input, shape index: {}]   ;;  %s827_s6 = inlined_call_operand.hbm [shape: f32[8,32], index: 6, kind: input, shape index: {}]   ;;  %s828_s7 = inlined_call_operand.hbm [shape: f32[8,32], index: 7, kind: input, shape index: {}]   ;;  %s829_s8 = inlined_call_operand.hbm [shape: f32[8,32], index: 8, kind: input, shape index: {}]   ;;  %s830_s9 = inlined_call_operand.hbm [shape: f32[8,32], index: 9, kind: output, shape index: {}]  }
   0x1   :  { %15 = vsyncpa [#allocation6], 0 }
   0x2   :  { %16 = vsyncpa [#allocation9], 0 }
   0x3   :  { %17 = vsyncpa [#allocation12], 0 }
   0x4   :  { %18 = vsyncpa [#allocation4], 0  ;;  %s664_s30 = smov [#allocation5]   ;;  %s665_s11 = smov [#allocation8]  }
   0x5   :  { %s57_s10 = sshll.u32 %s664_s30, 4  ;;  %s91_s12 = sshll.u32 %s665_s11, 4  ;;  %s58_s10 = int_to_ptr.vmem [resolvable:$true] %s57_s10  ;;  %s92_s12 = int_to_ptr.vmem [resolvable:$true] %s91_s12 }
   0x6   :  { %s522_s13 = scalar_lea.vmem %s58_s10, 128  ;;  %p527_p1 = scmp.lt.s32.totalorder %s58_s10, %s58_s10 }
   0x7   :  { %p523_p0 = scmp.ne.s32.totalorder %s58_s10, %s522_s13  ;;  %p528_p2 = scmp.lt.s32.totalorder %s522_s13, %s522_s13 }
   0x9   :  { %p529_p3 = por %p528_p2, %p527_p1 }
   0xb   :  { %p530_p4 = pnand %p529_p3, %p523_p0 }
   0xd   :  { %533 = shalt.err (!%p530_p4)
}
   0xe   :  { %60 = dma.hbm_to_vmem [thread:$0]  %s824_s3, 128, %s58_s10, [#allocation6]  }
   0xf   :  { %s542_s16 = scalar_lea.vmem %s92_s12, 128  ;;  %p547_p6 = scmp.lt.s32.totalorder %s92_s12, %s92_s12 }
  0x10   :  { %p543_p5 = scmp.ne.s32.totalorder %s92_s12, %s542_s16  ;;  %p548_p7 = scmp.lt.s32.totalorder %s542_s16, %s542_s16 }
  0x12   :  { %p549_p8 = por %p548_p7, %p547_p6 }
  0x14   :  { %p550_p9 = pnand %p549_p8, %p543_p5 }
  0x16   :  { %553 = shalt.err (!%p550_p9)
}
  0x17   :  { %94 = dma.hbm_to_vmem [thread:$0]  %s827_s6, 128, %s92_s12, [#allocation9]  }
  0x18   :  { %s666_s19 = smov [#allocation2]   ;;  %s667_s21 = smov [#allocation7]  }
  0x19   :  { %s44_s20 = sshll.u32 %s666_s19, 4  ;;  %s78_s22 = sshll.u32 %s667_s21, 4  ;;  %s45_s20 = int_to_ptr.vmem [resolvable:$true] %s44_s20  ;;  %s79_s22 = int_to_ptr.vmem [resolvable:$true] %s78_s22 }
  0x1a   :  { %s562_s23 = scalar_lea.vmem %s45_s20, 128  ;;  %p567_p11 = scmp.lt.s32.totalorder %s45_s20, %s45_s20 }
  0x1b   :  { %p563_p10 = scmp.ne.s32.totalorder %s45_s20, %s562_s23  ;;  %p568_p12 = scmp.lt.s32.totalorder %s562_s23, %s562_s23 }
  0x1d   :  { %p569_p13 = por %p568_p12, %p567_p11 }
  0x1f   :  { %p570_p0 = pnand %p569_p13, %p563_p10 }
  0x21   :  { %573 = shalt.err (!%p570_p0)
}
  0x22   :  { %47 = dma.hbm_to_vmem [thread:$0]  %s823_s2, 128, %s45_s20, [#allocation3]  }
  0x23   :  { %s582_s25 = scalar_lea.vmem %s79_s22, 128  ;;  %p587_p2 = scmp.lt.s32.totalorder %s79_s22, %s79_s22 }
  0x24   :  { %p583_p1 = scmp.ne.s32.totalorder %s79_s22, %s582_s25  ;;  %p588_p3 = scmp.lt.s32.totalorder %s582_s25, %s582_s25 }
  0x26   :  { %p589_p4 = por %p588_p3, %p587_p2 }
  0x28   :  { %p590_p5 = pnand %p589_p4, %p583_p1 }
  0x2a   :  { %593 = shalt.err (!%p590_p5)
}
  0x2b   :  { %81 = dma.hbm_to_vmem [thread:$0]  %s826_s5, 128, %s79_s22, [#allocation6]  }
  0x2c   :  { %s668_s27 = smov [#allocation10]   ;;  %s669_s29 = smov [#allocation11]  }
  0x2d   :  { %s104_s28 = sshll.u32 %s668_s27, 4  ;;  %s117_s30 = sshll.u32 %s669_s29, 4  ;;  %s105_s28 = int_to_ptr.vmem [resolvable:$true] %s104_s28  ;;  %s118_s30 = int_to_ptr.vmem [resolvable:$true] %s117_s30 }
  0x2e   :  { %s602_s10 = scalar_lea.vmem %s105_s28, 128  ;;  %p607_p7 = scmp.lt.s32.totalorder %s105_s28, %s105_s28 }
  0x2f   :  { %p603_p6 = scmp.ne.s32.totalorder %s105_s28, %s602_s10  ;;  %p608_p8 = scmp.lt.s32.totalorder %s602_s10, %s602_s10 }
  0x31   :  { %p609_p9 = por %p608_p8, %p607_p7 }
  0x33   :  { %p610_p10 = pnand %p609_p9, %p603_p6 }
  0x35   :  { %613 = shalt.err (!%p610_p10)
}
  0x36   :  { %107 = dma.hbm_to_vmem [thread:$0]  %s828_s7, 128, %s105_s28, [#allocation9]  }
  0x37   :  { %s622_s12 = scalar_lea.vmem %s118_s30, 128  ;;  %p627_p12 = scmp.lt.s32.totalorder %s118_s30, %s118_s30 }
  0x38   :  { %p623_p11 = scmp.ne.s32.totalorder %s118_s30, %s622_s12  ;;  %p628_p13 = scmp.lt.s32.totalorder %s622_s12, %s622_s12 }
  0x3a   :  { %p629_p0 = por %p628_p13, %p627_p12 }
  0x3c   :  { %p630_p1 = pnand %p629_p0, %p623_p11 }
  0x3e   :  { %633 = shalt.err (!%p630_p1)
}
  0x3f   :  { %120 = dma.hbm_to_vmem [thread:$0]  %s829_s8, 128, %s118_s30, [#allocation12]  }
  0x40   :  { %654 = dma.done.wait [#allocation3], 128  }
  0x41   :  { %655 = vsyncadd [#allocation3], 4294967168 }
  0x42   :  { %656 = dma.done.wait [#allocation6], 256  }
  0x43   :  { %657 = vsyncadd [#allocation6], 4294967040 }
  0x44   :  { %658 = dma.done.wait [#allocation9], 256  }
  0x45   :  { %659 = vsyncadd [#allocation9], 4294967040 }
  0x46   :  { %660 = dma.done.wait [#allocation12], 128  }
  0x47   :  { %661 = vsyncadd [#allocation12], 4294967168  ;;  %vm182_vm0 = vcmask 261120   ;;  %v219_v0 = vld [vmem:[#allocation8] sm:$0xff]  ;;  %v245_v1 = vld [vmem:[#allocation11] sm:$0xff]  ;;  %v670_v16 = vmov 0  }
  0x48   :  { %v232_v2 = vld [vmem:[#allocation10] sm:$0xff]  ;;  %v220_v3 = vsel %vm182_vm0, %v219_v0, -inf  ;;  %v246_v4 = vsel %vm182_vm0, %v245_v1, -inf  ;;  %v196_v5 = vld [vmem:[#allocation7] sm:$0xff]  ;;  %v384_v13 = vld [vmem:[#allocation5] sm:$0xff]  ;;  %473 = vset.pattern.permute.xlu1 %v670_v16  ;;  %472 = vset.pattern.permute.xlu0 %v670_v16  ;;  %v671_v17 = vmov 0.0  }
  0x49   :  { %221 = vmax.xlane.f32.xlu0 %v220_v3  ;;  %247 = vmax.xlane.f32.xlu1 %v246_v4  ;;  %v233_v6 = vsel %vm182_vm0, %v232_v2, -inf  ;;  %v198_v7 = vsel %vm182_vm0, %v196_v5, -inf  ;;  %v272_v8 = vld [vmem:[%s825_s4] sm:$0xff]  ;;  %v385_v15 = vsel %vm182_vm0, %v384_v13, -inf  ;;  %183 = vst.msk [vmem:[#allocation13] sm:$0xff] %vm182_vm0, %v671_v17  ;;  %v185_v4 = vlaneseq }
  0x4a   :  { %v298_v9 = vld [vmem:[%s822_s1] sm:$0xff]  ;;  %v273_v10 = vsel %vm182_vm0, %v272_v8, -inf  ;;  %vm269_vm3 = vcmask 253952  }
  0x4b   :  { %v299_v11 = vsel %vm182_vm0, %v298_v9, -inf  ;;  %v341_v12 = vld [vmem:[#allocation2] sm:$0xff] }
  0x4c   :  { %v342_v14 = vsel %vm182_vm0, %v341_v12, -inf  ;;  %v184_v58 = vld [vmem:[%s821_s0] sm:$0xff]  ;;  %s672_s0 = smov [#allocation13]  }
  0x4d   :  { %234 = vmax.xlane.f32.xlu0 %v233_v6  ;;  %199 = vmax.xlane.f32.xlu1 %v198_v7  ;;  %vm193_vm1 = vcmp.ge.s32.totalorder %v184_v58, 0  ;;  %s431_s16 = sshll.u32 %s672_s0, 4  ;;  %s432_s16 = int_to_ptr.vmem [resolvable:$true] %s431_s16 }
  0x4e   :  { %v462_v59 = vsel %vm193_vm1, 1.0, %v671_v17  ;;  %s634_s17 = scalar_lea.vmem %s432_s16, 128  ;;  %p639_p3 = scmp.lt.s32.totalorder %s432_s16, %s432_s16 }
  0x4f   :  { %p635_p2 = scmp.ne.s32.totalorder %s432_s16, %s634_s17  ;;  %p640_p4 = scmp.lt.s32.totalorder %s634_s17, %s634_s17 }
  0x51   :  { %274 = vmax.xlane.f32.xlu0 %v273_v10  ;;  %300 = vmax.xlane.f32.xlu1 %v299_v11  ;;  %p641_p5 = por %p640_p4, %p639_p3 }
  0x53   :  { %p642_p6 = pnand %p641_p5, %p635_p2 }
  0x55   :  { %343 = vmax.xlane.f32.xlu0 %v342_v14  ;;  %386 = vmax.xlane.f32.xlu1 %v385_v15 }
  0xd2   :  { %v222_v18 = vpop.xlane.xlu0 %221  ;;  %v248_v19 = vpop.xlane.xlu1 %247 }
  0xd3   :  { %v223_v20 = vsub.f32 %v219_v0, %v222_v18  ;;  %v249_v21 = vsub.f32 %v245_v1, %v248_v19 }
  0xd5   :  { %v224_v22 = vmul.f32 1.442695, %v223_v20  ;;  %v250_v23 = vmul.f32 1.442695, %v249_v21 }
  0xd6   :  { %v235_v24 = vpop.xlane.xlu0 %234  ;;  %v200_v25 = vpop.xlane.xlu1 %199 }
  0xd7   :  { %474 = vpow2.f32 %v224_v22  ;;  %v236_v26 = vsub.f32 %v232_v2, %v235_v24  ;;  %v757_v27 = vsub.f32 %v196_v5, %v200_v25 }
  0xd8   :  { %476 = vpow2.f32 %v250_v23 }
  0xd9   :  { %v237_v28 = vmul.f32 1.442695, %v236_v26  ;;  %v202_v29 = vmul.f32 1.442695, %v757_v27 }
  0xda   :  { %v275_v30 = vpop.xlane.xlu0 %274  ;;  %v301_v31 = vpop.xlane.xlu1 %300 }
  0xdb   :  { %478 = vpow2.f32 %v237_v28  ;;  %v760_v32 = vsub.f32 %v272_v8, %v275_v30  ;;  %v762_v33 = vsub.f32 %v298_v9, %v301_v31  ;;  %v186_v8 = vand.u32 127, %v185_v4 }
  0xdc   :  { %480 = vpow2.f32 %v202_v29 }
  0xdd   :  { %v277_v34 = vmul.f32 1.442695, %v760_v32  ;;  %v303_v35 = vmul.f32 1.442695, %v762_v33 }
  0xde   :  { %v344_v36 = vpop.xlane.xlu0 %343  ;;  %v387_v37 = vpop.xlane.xlu1 %386 }
  0xdf   :  { %482 = vpow2.f32 %v277_v34  ;;  %v766_v38 = vsub.f32 %v341_v12, %v344_v36  ;;  %v768_v39 = vsub.f32 %v384_v13, %v387_v37 }
  0xe0   :  { %484 = vpow2.f32 %v303_v35 }
  0xe1   :  { %v346_v40 = vmul.f32 1.442695, %v766_v38  ;;  %v389_v41 = vmul.f32 1.442695, %v768_v39 }
  0xe3   :  { %486 = vpow2.f32 %v346_v40 }
  0xe4   :  { %v475_v42 = vpop.eup %474  ;;  %488 = vpow2.f32 %v389_v41 }
  0xe5   :  { %v477_v43 = vpop.eup %476  ;;  %v226_v44 = vsel %vm182_vm0, %v475_v42, 0.0 }
  0xe6   :  { %227 = vadd.xlane.f32.xlu0 %v226_v44  ;;  %v252_v45 = vsel %vm182_vm0, %v477_v43, 0.0 }
  0xe8   :  { %v479_v46 = vpop.eup %478 }
  0xe9   :  { %v481_v47 = vpop.eup %480  ;;  %v239_v48 = vsel %vm182_vm0, %v479_v46, 0.0 }
  0xea   :  { %253 = vadd.xlane.f32.xlu0 %v252_v45  ;;  %240 = vadd.xlane.f32.xlu1 %v239_v48  ;;  %v204_v49 = vsel %vm182_vm0, %v481_v47, 0.0 }
  0xec   :  { %v483_v50 = vpop.eup %482 }
  0xed   :  { %v776_v51 = vpop.eup %484  ;;  %v279_v52 = vsel %vm182_vm0, %v483_v50, 0.0 }
  0xee   :  { %280 = vadd.xlane.f32.xlu0 %v279_v52  ;;  %205 = vadd.xlane.f32.xlu1 %v204_v49  ;;  %v305_v53 = vsel %vm182_vm0, %v776_v51, 0.0 }
  0xf0   :  { %v781_v54 = vpop.eup %486 }
  0xf1   :  { %v783_v55 = vpop.eup %488  ;;  %v348_v56 = vsel %vm182_vm0, %v781_v54, 0.0 }
  0xf2   :  { %349 = vadd.xlane.f32.xlu0 %v348_v56  ;;  %306 = vadd.xlane.f32.xlu1 %v305_v53  ;;  %v391_v57 = vsel %vm182_vm0, %v783_v55, 0.0 }
  0xf6   :  { %392 = vadd.xlane.f32.xlu1 %v391_v57 }
 0x107   :  { %215 = vperm.xlu1 %473, %v462_v59  }
 0x108   :  { %188 = vperm.xlu0 %472, %v184_v58  }
 0x16f   :  { %v228_v60 = vpop.xlane.xlu0 %227 }
 0x170   :  { %490 = vrcp.f32 %v228_v60 }
 0x173   :  { %v254_v61 = vpop.xlane.xlu0 %253  ;;  %v241_v62 = vpop.xlane.xlu1 %240 }
 0x174   :  { %492 = vrcp.f32 %v254_v61 }
 0x175   :  { %494 = vrcp.f32 %v241_v62 }
 0x177   :  { %v281_v63 = vpop.xlane.xlu0 %280  ;;  %v206_v0 = vpop.xlane.xlu1 %205 }
 0x178   :  { %496 = vlog2.f32 %v281_v63 }
 0x179   :  { %498 = vlog2.f32 %v206_v0 }
 0x17a   :  { %500 = vrcp.f32 %v206_v0 }
 0x17b   :  { %v350_v1 = vpop.xlane.xlu0 %349  ;;  %v307_v2 = vpop.xlane.xlu1 %306 }
 0x17c   :  { %502 = vlog2.f32 %v350_v1 }
 0x17d   :  { %504 = vrcp.f32 %v350_v1  ;;  %v491_v5 = vpop.eup %490 }
 0x17e   :  { %506 = vlog2.f32 %v307_v2  ;;  %v231_v13 = vmul.f32 %v491_v5, %v475_v42 }
 0x17f   :  { %508 = vrcp.f32 %v307_v2  ;;  %v393_v3 = vpop.xlane.xlu1 %392 }
 0x180   :  { %510 = vlog2.f32 %v393_v3 }
 0x181   :  { %v493_v6 = vpop.eup %492  ;;  %512 = vrcp.f32 %v393_v3 }
 0x182   :  { %v495_v7 = vpop.eup %494  ;;  %v257_v10 = vmul.f32 %v493_v6, %v477_v43 }
 0x183   :  { %v244_v9 = vmul.f32 %v495_v7, %v479_v46  ;;  %v189_v11 = vpop.permute.xlu0 %188  ;;  %v216_v21 = vpop.permute.xlu1 %215 }
 0x184   :  { %vm190_vm2 = vcmp.eq.s32.totalorder %v186_v8, %v189_v11  ;;  %v339_v20 = vadd.f32 %v257_v10, %v231_v13 }
 0x185   :  { %v497_v12 = vpop.eup %496  ;;  %v296_v19 = vadd.f32 %v257_v10, %v244_v9  ;;  %v382_v24 = vadd.f32 %v244_v9, %v231_v13  ;;  %v461_v31 = vsel %vm190_vm2, 1.0, %v671_v17 }
 0x186   :  { %v499_v14 = vpop.eup %498  ;;  %v283_v15 = vmul.f32 0.6931472, %v497_v12  ;;  %v340_v37 = vmul.f32 0.5, %v339_v20 }
 0x187   :  { %v501_v16 = vpop.eup %500  ;;  %v208_v18 = vmul.f32 0.6931472, %v499_v14  ;;  %v297_v36 = vmul.f32 0.5, %v296_v19  ;;  %v383_v44 = vmul.f32 0.5, %v382_v24  ;;  %v271_v24 = vld [vmem:[#allocation13 + $0x1] sm:$0x1] }
 0x188   :  { %v284_v22 = vsub.f32 %v760_v32, %v283_v15  ;;  %v212_v23 = vmul.f32 %v501_v16, %v481_v47 }
 0x189   :  { %v503_v25 = vpop.eup %502  ;;  %v209_v26 = vsub.f32 %v757_v27, %v208_v18 }
 0x18a   :  { %v505_v28 = vpop.eup %504  ;;  %v352_v29 = vmul.f32 0.6931472, %v503_v25  ;;  %v285_v30 = vsub.f32 0.0, %v284_v22  ;;  %v218_v34 = vmul.f32 %v216_v21, %v212_v23 }
 0x18b   :  { %v507_v35 = vpop.eup %506  ;;  %v356_v40 = vmul.f32 %v505_v28, %v781_v54 }
 0x18c   :  { %v509_v41 = vpop.eup %508  ;;  %v353_v42 = vsub.f32 %v766_v38, %v352_v29  ;;  %v309_v32 = vmul.f32 0.6931472, %v507_v35  ;;  %v286_v43 = vmul.f32 %v461_v31, %v285_v30  ;;  %v258_v47 = vadd.f32 %v461_v31, %v218_v34  ;;  %v259_v30 = vld [vmem:[#allocation13] sm:$0x1] }
 0x18d   :  { %v511_v45 = vpop.eup %510  ;;  %v313_v27 = vmul.f32 %v509_v41, %v776_v51  ;;  %v369_v46 = vsub.f32 %v356_v40, %v340_v37  ;;  %v260_v48 = vmul.f32 %v218_v34, %v209_v26 }
 0x18e   :  { %v513_v49 = vpop.eup %512  ;;  %v358_v17 = vsub.f32 0.0, %v353_v42  ;;  %v310_v50 = vsub.f32 %v762_v33, %v309_v32  ;;  %v395_v52 = vmul.f32 0.6931472, %v511_v45  ;;  %v287_v53 = vsel %vm182_vm0, %v286_v43, 0.0 }
 0x18f   :  { %v288_v54 = vrot.slane %v287_v53, 4  ;;  %v326_v56 = vsub.f32 %v313_v27, %v297_v36  ;;  %v399_v38 = vmul.f32 %v513_v49, %v783_v55  ;;  %v261_v57 = vsel %vm182_vm0, %v260_v48, 0.0 }
 0x190   :  { %v315_v58 = vsub.f32 0.0, %v310_v50  ;;  %v396_v59 = vsub.f32 %v768_v39, %v395_v52  ;;  %v262_v51 = vrot.slane %v261_v57, 4  ;;  %v359_v60 = vmul.f32 %v358_v17, %v258_v47  ;;  %v314_v52 = vld [vmem:[#allocation13 + $0x2] sm:$0x1] }
 0x191   :  { %v289_v61 = vadd.f32 %v288_v54, %v287_v53  ;;  %v412_v62 = vsub.f32 %v399_v38, %v383_v44  ;;  %v327_v63 = vmul.f32 %v326_v56, %v216_v21  ;;  %v370_v0 = vmul.f32 %v369_v46, %v216_v21  ;;  %v357_v46 = vld [vmem:[#allocation13 + $0x3] sm:$0x1] }
 0x192   :  { %v401_v1 = vsub.f32 0.0, %v396_v59  ;;  %v263_v33 = vadd.f32 %v262_v51, %v261_v57  ;;  %v316_v2 = vmul.f32 %v315_v58, %v258_v47  ;;  %v360_v3 = vsel %vm182_vm0, %v359_v60, 0.0  ;;  %v328_v57 = vld [vmem:[#allocation13 + $0x5] sm:$0x1]  ;;  %v371_v60 = vld [vmem:[#allocation13 + $0x6] sm:$0x1] }
 0x193   :  { %v290_v4 = vrot.slane %v289_v61, 2  ;;  %v329_v5 = vmul.f32 %v327_v63, %v327_v63  ;;  %v361_v55 = vrot.slane %v360_v3, 4  ;;  %v372_v6 = vmul.f32 %v370_v0, %v370_v0 }
 0x194   :  { %v264_v7 = vrot.slane %v263_v33, 2  ;;  %v317_v8 = vsel %vm182_vm0, %v316_v2, 0.0  ;;  %v402_v39 = vmul.f32 %v401_v1, %v258_v47  ;;  %v413_v9 = vmul.f32 %v412_v62, %v216_v21  ;;  %v400_v1 = vld [vmem:[#allocation13 + $0x4] sm:$0x1] }
 0x195   :  { %v291_v10 = vadd.f32 %v290_v4, %v289_v61  ;;  %v318_v11 = vrot.slane %v317_v8, 4  ;;  %v330_v12 = vsel %vm182_vm0, %v329_v5, 0.0  ;;  %v362_v13 = vadd.f32 %v361_v55, %v360_v3 }
 0x196   :  { %v265_v14 = vadd.f32 %v264_v7, %v263_v33  ;;  %v331_v15 = vrot.slane %v330_v12, 4  ;;  %v373_v16 = vsel %vm182_vm0, %v372_v6, 0.0  ;;  %v403_v18 = vsel %vm182_vm0, %v402_v39, 0.0  ;;  %v414_v6 = vld [vmem:[#allocation13 + $0x7] sm:$0x1] }
 0x197   :  { %v292_v19 = vrot.slane %v291_v10, 1  ;;  %v319_v20 = vadd.f32 %v318_v11, %v317_v8  ;;  %v363_v22 = vrot.slane %v362_v13, 2  ;;  %v374_v23 = vrot.slane %v373_v16, 4 }
 0x198   :  { %v266_v25 = vrot.slane %v265_v14, 1  ;;  %v332_v26 = vadd.f32 %v331_v15, %v330_v12  ;;  %v404_v28 = vrot.slane %v403_v18, 4  ;;  %v415_v21 = vmul.f32 %v413_v9, %v413_v9 }
 0x199   :  { %v293_v29 = vadd.f32 %v292_v19, %v291_v10  ;;  %v320_v31 = vrot.slane %v319_v20, 2  ;;  %v364_v34 = vadd.f32 %v363_v22, %v362_v13  ;;  %v375_v35 = vadd.f32 %v374_v23, %v373_v16 }
 0x19a   :  { %v267_v36 = vadd.f32 %v266_v25, %v265_v14  ;;  %v333_v37 = vrot.slane %v332_v26, 2  ;;  %v405_v40 = vadd.f32 %v404_v28, %v403_v18  ;;  %v416_v41 = vsel %vm182_vm0, %v415_v21, 0.0 }
 0x19b   :  { %v294_v42 = vadd.f32 %v293_v29, %v271_v24  ;;  %v321_v32 = vadd.f32 %v320_v31, %v319_v20  ;;  %v365_v43 = vrot.slane %v364_v34, 1  ;;  %v376_v44 = vrot.slane %v375_v35, 2 }
 0x19c   :  { %v268_v45 = vadd.f32 %v267_v36, %v259_v30  ;;  %v334_v27 = vadd.f32 %v333_v37, %v332_v26  ;;  %v406_v47 = vrot.slane %v405_v40, 2  ;;  %v417_v48 = vrot.slane %v416_v41, 4 }
 0x19d   :  { %295 = vst.msk [vmem:[#allocation13 + $0x1] sm:$0x1] %vm269_vm3, %v294_v42  ;;  %v322_v49 = vrot.slane %v321_v32, 1  ;;  %v366_v17 = vadd.f32 %v365_v43, %v364_v34  ;;  %v377_v50 = vadd.f32 %v376_v44, %v375_v35 }
 0x19e   :  { %270 = vst.msk [vmem:[#allocation13] sm:$0x1] %vm269_vm3, %v268_v45  ;;  %v335_v53 = vrot.slane %v334_v27, 1  ;;  %v407_v54 = vadd.f32 %v406_v47, %v405_v40  ;;  %v418_v56 = vadd.f32 %v417_v48, %v416_v41 }
 0x19f   :  { %v323_v38 = vadd.f32 %v322_v49, %v321_v32  ;;  %v367_v58 = vadd.f32 %v366_v17, %v357_v46  ;;  %v378_v59 = vrot.slane %v377_v50, 1 }
 0x1a0   :  { %v336_v51 = vadd.f32 %v335_v53, %v334_v27  ;;  %v408_v61 = vrot.slane %v407_v54, 1  ;;  %v419_v62 = vrot.slane %v418_v56, 2 }
 0x1a1   :  { %v324_v63 = vadd.f32 %v323_v38, %v314_v52  ;;  %v379_v0 = vadd.f32 %v378_v59, %v377_v50  ;;  %368 = vst.msk [vmem:[#allocation13 + $0x3] sm:$0x1] %vm269_vm3, %v367_v58 }
 0x1a2   :  { %v337_v33 = vadd.f32 %v336_v51, %v328_v57  ;;  %v409_v2 = vadd.f32 %v408_v61, %v407_v54  ;;  %v420_v3 = vadd.f32 %v419_v62, %v418_v56 }
 0x1a3   :  { %v380_v4 = vadd.f32 %v379_v0, %v371_v60  ;;  %325 = vst.msk [vmem:[#allocation13 + $0x2] sm:$0x1] %vm269_vm3, %v324_v63 }
 0x1a4   :  { %338 = vst.msk [vmem:[#allocation13 + $0x5] sm:$0x1] %vm269_vm3, %v337_v33  ;;  %v410_v5 = vadd.f32 %v409_v2, %v400_v1  ;;  %v421_v55 = vrot.slane %v420_v3, 1 }
 0x1a5   :  { %381 = vst.msk [vmem:[#allocation13 + $0x6] sm:$0x1] %vm269_vm3, %v380_v4 }
 0x1a6   :  { %v422_v7 = vadd.f32 %v421_v55, %v420_v3  ;;  %411 = vst.msk [vmem:[#allocation13 + $0x4] sm:$0x1] %vm269_vm3, %v410_v5 }
 0x1a8   :  { %v423_v8 = vadd.f32 %v422_v7, %v414_v6 }
 0x1aa   :  { %424 = vst.msk [vmem:[#allocation13 + $0x7] sm:$0x1] %vm269_vm3, %v423_v8 }
 0x1ab   :  { %645 = shalt.err (!%p642_p6)
}
 0x1ac   :  { %434 = dma.vmem_to_hbm [thread:$0]  %s432_s16, 128, %s830_s9, [#allocation4]  }
 0x1ad   :  { %662 = dma.done.wait [#allocation4], 128  }
 0x1ae   :  { %663 = vsyncadd [#allocation4], 4294967168 }
 0x1af   :  { %438 = vsyncpa [#allocation3], 1 }
 0x1b0   :  { %439 = vsyncpa [#allocation6], 1 }
 0x1b1   :  { %440 = vsyncpa [#allocation9], 1 }
 0x1b2   :  { %441 = vsyncpa [#allocation12], 1 }
 0x1b3   :  { %442 = vsyncpa [#allocation4], 1 }

</bundles_post_ra>
